<compile_context>
chip_gen: v7x
topology: tpu7x:2x2x1
jax: 0.10.0
libtpu: 0.0.40
codegen_flags: <defaults>
</compile_context>

<pallas_src>
import jax
import jax.numpy as jnp
from jax.experimental import pallas as pl
from jax.experimental.pallas import tpu as pltpu

# ----- small synthetic config (toy sizes consistent with the module) -----
BATCH = 2
SEQ = 8
HIDDEN = 32
VOCAB = 512          # small, but > one vocab tile so the caching path is exercised
LN_EPS = 1e-12
NSP_LANES = 128      # pad width-2 NSP output to a full lane group
_INV_SQRT2 = 0.7071067811865476


def _round_up(x, m):
    return (x + m - 1) // m * m


def _gelu_exact(x):
    # exact (erf-based) GELU, matching HF ACT2FN["gelu"]
    return 0.5 * x * (1.0 + jax.lax.erf(x * _INV_SQRT2))


def mlm_nsp_kernel(x_ref, wd_ref, bd_ref, gamma_ref, beta_ref,
                   wdec_ref, bdec_ref, pooled_ref, nspw_ref, nspb_ref,
                   pred_ref, nsp_ref, h_scratch):
    # grid = (row_tiles, vocab_tiles); vocab is the inner ("arbitrary") axis.
    @pl.when(pl.program_id(1) == 0)
    def _():
        # ---- BertPredictionHeadTransform: dense -> GELU -> LayerNorm ----
        # bf16 MXU matmul with f32 accumulation; elementwise epilogue in f32.
        h = jnp.dot(x_ref[...], wd_ref[...],
                    preferred_element_type=jnp.float32) + bd_ref[...]
        h = _gelu_exact(h)
        mu = jnp.mean(h, axis=-1, keepdims=True)
        var = jnp.mean((h - mu) * (h - mu), axis=-1, keepdims=True)
        h = (h - mu) * jax.lax.rsqrt(var + LN_EPS) * gamma_ref[...] + beta_ref[...]
        h_scratch[...] = h.astype(h_scratch.dtype)   # cached across vocab tiles

        # ---- NSP head (seq_relationship): tiny, lane-padded, f32 ----
        # Recomputed per row tile (negligible) so each output block has a
        # unique writer and stores are lane-dense; wrapper reads block 0.
        nsp_ref[...] = (jnp.dot(pooled_ref[...], nspw_ref[...],
                                preferred_element_type=jnp.float32)
                        + nspb_ref[...])

    # ---- decoder: (tm, H) @ (H, tn) bf16 panel per (i, j) step ----
    pred_ref[...] = (jnp.dot(h_scratch[...], wdec_ref[...],
                             preferred_element_type=jnp.float32)
                     + bdec_ref[...])


def bert_pretraining_heads(sequence_output, pooled_output, params,
                           *, tm=256, tn=2048):
    """prediction_scores [B,S,V] (f32), seq_relationship_score [B,2] (f32)."""
    B, S, H = sequence_output.shape
    V = params["decoder_w"].shape[1]
    M = B * S

    assert tm % 8 == 0, "row tile must be a multiple of 8 (sublane)"
    assert tn % 128 == 0, "vocab tile must be a multiple of 128 (lane-dense stores)"

    M_pad = _round_up(M, tm)
    V_pad = _round_up(V, tn)
    Bp = _round_up(B, 8)
    gm, gn = M_pad // tm, V_pad // tn

    # ---- wrapper-side layout plumbing (padding + bf16 weight casts) ----
    x2d = sequence_output.reshape(M, H).astype(jnp.bfloat16)
    x2d = jnp.pad(x2d, ((0, M_pad - M), (0, 0)))
    dense_w = params["dense_w"].astype(jnp.bfloat16)                     # [H, H]
    dec_w = jnp.pad(params["decoder_w"].astype(jnp.bfloat16),
                    ((0, 0), (0, V_pad - V)))                            # [H, Vp]
    dec_b = jnp.pad(params["decoder_b"], ((0, 0), (0, V_pad - V)))       # [1, Vp]
    pooled = jnp.pad(pooled_output, ((0, Bp - B), (0, 0)))               # [Bp, H]
    nsp_w = jnp.pad(params["nsp_w"], ((0, 0), (0, NSP_LANES - 2)))       # [H, 128]
    nsp_b = jnp.pad(params["nsp_b"], ((0, 0), (0, NSP_LANES - 2)))       # [1, 128]

    cost = pl.CostEstimate(
        flops=2 * M_pad * H * H + 2 * M_pad * H * V_pad
              + 2 * gm * Bp * H * NSP_LANES,
        transcendentals=M_pad * H,                     # erf in GELU
        bytes_accessed=(x2d.size * 2 + dense_w.size * 2 + dec_w.size * 2
                        + dec_b.size * 4 + M_pad * V_pad * 4
                        + gm * Bp * NSP_LANES * 4),
    )

    pred_pad, nsp_pad = pl.pallas_call(
        mlm_nsp_kernel,
        out_shape=(
            jax.ShapeDtypeStruct((M_pad, V_pad), jnp.float32),
            jax.ShapeDtypeStruct((gm * Bp, NSP_LANES), jnp.float32),
        ),
        grid_spec=pltpu.PrefetchScalarGridSpec(
            num_scalar_prefetch=0,
            grid=(gm, gn),
            in_specs=[
                pl.BlockSpec((tm, H), lambda i, j: (i, 0)),          # x rows
                pl.BlockSpec((H, H), lambda i, j: (0, 0)),           # dense_w
                pl.BlockSpec((1, H), lambda i, j: (0, 0)),           # dense_b
                pl.BlockSpec((1, H), lambda i, j: (0, 0)),           # ln_gamma
                pl.BlockSpec((1, H), lambda i, j: (0, 0)),           # ln_beta
                pl.BlockSpec((H, tn), lambda i, j: (0, j)),          # decoder_w panel
                pl.BlockSpec((1, tn), lambda i, j: (0, j)),          # decoder_b panel
                pl.BlockSpec((Bp, H), lambda i, j: (0, 0)),          # pooled
                pl.BlockSpec((H, NSP_LANES), lambda i, j: (0, 0)),   # nsp_w (padded)
                pl.BlockSpec((1, NSP_LANES), lambda i, j: (0, 0)),   # nsp_b (padded)
            ],
            out_specs=[
                pl.BlockSpec((tm, tn), lambda i, j: (i, j)),         # prediction scores
                pl.BlockSpec((Bp, NSP_LANES), lambda i, j: (i, 0)),  # NSP (per row tile)
            ],
            scratch_shapes=[pltpu.VMEM((tm, H), jnp.bfloat16)],      # cached transform
        ),
        compiler_params=pltpu.CompilerParams(
            dimension_semantics=("parallel", "arbitrary"),
            # sized so double-buffered bf16 weight panels + f32 output tile fit
            # comfortably inside v7x's 64 MiB VMEM as well as v5e/v6e.
            vmem_limit_bytes=48 * 1024 * 1024,
        ),
        cost_estimate=cost,
    )(x2d, dense_w, params["dense_b"], params["ln_gamma"], params["ln_beta"],
      dec_w, dec_b, pooled, nsp_w, nsp_b)

    prediction_scores = pred_pad[:M, :V].reshape(B, S, V)
    seq_relationship_score = nsp_pad[:B, :2]
    return prediction_scores, seq_relationship_score


def make_params(key):
    ks = jax.random.split(key, 6)
    std = 0.02
    return {
        # stored pre-transposed (in_features x out_features) so the kernel does x @ W
        "dense_w": jax.random.normal(ks[0], (HIDDEN, HIDDEN), jnp.float32) * std,
        "dense_b": jax.random.normal(ks[1], (1, HIDDEN), jnp.float32) * std,
        "ln_gamma": jnp.ones((1, HIDDEN), jnp.float32),
        "ln_beta": jnp.zeros((1, HIDDEN), jnp.float32),
        "decoder_w": jax.random.normal(ks[2], (HIDDEN, VOCAB), jnp.float32) * std,
        "decoder_b": jnp.zeros((1, VOCAB), jnp.float32),   # nn.Parameter(torch.zeros(V))
        "nsp_w": jax.random.normal(ks[3], (HIDDEN, 2), jnp.float32) * std,
        "nsp_b": jax.random.normal(ks[4], (1, 2), jnp.float32) * std,
    }


def reference(sequence_output, pooled_output, params):
    # pure-JAX f32 reference (matches the PyTorch forward semantics)
    x = sequence_output
    h = x @ params["dense_w"] + params["dense_b"][0]
    h = _gelu_exact(h)
    mu = jnp.mean(h, axis=-1, keepdims=True)
    var = jnp.mean((h - mu) ** 2, axis=-1, keepdims=True)
    h = (h - mu) / jnp.sqrt(var + LN_EPS) * params["ln_gamma"][0] + params["ln_beta"][0]
    scores = h @ params["decoder_w"] + params["decoder_b"][0]
    nsp = pooled_output @ params["nsp_w"] + params["nsp_b"][0]
    return scores, nsp


if __name__ == "__main__":
    key = jax.random.PRNGKey(0)
    k_seq, k_pool, k_par = jax.random.split(key, 3)
    sequence_output = jax.random.normal(k_seq, (BATCH, SEQ, HIDDEN), jnp.float32)
    pooled_output = jax.random.normal(k_pool, (BATCH, HIDDEN), jnp.float32)
    params = make_params(k_par)

    # toy-size tiles: tm covers the 16 rows; tn=128 -> 4 vocab tiles so the
    # pl.when-gated transform caching and the weight-panel pipeline are exercised.
    pred_scores, nsp_scores = jax.block_until_ready(
        bert_pretraining_heads(sequence_output, pooled_output, params,
                               tm=16, tn=128))

    ref_scores, ref_nsp = reference(sequence_output, pooled_output, params)
    assert pred_scores.shape == (BATCH, SEQ, VOCAB)
    assert nsp_scores.shape == (BATCH, 2)
    # MLM path uses bf16 MXU inputs with f32 accumulation -> relaxed tolerance.
    assert jnp.allclose(pred_scores, ref_scores, atol=2e-2, rtol=2e-2)
    # NSP path is computed entirely in f32.
    assert jnp.allclose(nsp_scores, ref_nsp, atol=1e-4, rtol=1e-4)
    print("KERNEL_OK")
</pallas_src>

<mosaic_0001>
module attributes {stable_mosaic.version = 11 : i64} {
  func.func @mlm_nsp_kernel(%arg0: i32, %arg1: i32, %arg2: memref<16x32xbf16, #tpu.memory_space<vmem>>, %arg3: memref<32x32xbf16, #tpu.memory_space<vmem>>, %arg4: memref<1x32xf32, #tpu.memory_space<vmem>>, %arg5: memref<1x32xf32, #tpu.memory_space<vmem>>, %arg6: memref<1x32xf32, #tpu.memory_space<vmem>>, %arg7: memref<32x128xbf16, #tpu.memory_space<vmem>>, %arg8: memref<1x128xf32, #tpu.memory_space<vmem>>, %arg9: memref<8x32xf32, #tpu.memory_space<vmem>>, %arg10: memref<32x128xf32, #tpu.memory_space<vmem>>, %arg11: memref<1x128xf32, #tpu.memory_space<vmem>>, %arg12: memref<16x128xf32, #tpu.memory_space<vmem>>, %arg13: memref<8x128xf32, #tpu.memory_space<vmem>>, %arg14: memref<16x32xbf16, #tpu.memory_space<vmem>>) attributes {dimension_semantics = [#tpu.dimension_semantics<parallel>, #tpu.dimension_semantics<arbitrary>], iteration_bounds = array<i64: 1, 4>, scalar_prefetch = 0 : i64, scratch_operands = 1 : i64, tpu.core_type = #tpu.core_type<tc>, window_params = [{transform_indices = @transform_0, window_bounds = array<i64: 16, 32>}, {pipeline_mode = #tpu.pipeline_mode<synchronous>, transform_indices = @transform_1, window_bounds = array<i64: 32, 32>}, {pipeline_mode = #tpu.pipeline_mode<synchronous>, transform_indices = @transform_2, window_bounds = array<i64: 1, 32>}, {pipeline_mode = #tpu.pipeline_mode<synchronous>, transform_indices = @transform_3, window_bounds = array<i64: 1, 32>}, {pipeline_mode = #tpu.pipeline_mode<synchronous>, transform_indices = @transform_4, window_bounds = array<i64: 1, 32>}, {transform_indices = @transform_5, window_bounds = array<i64: 32, 128>}, {transform_indices = @transform_6, window_bounds = array<i64: 1, 128>}, {pipeline_mode = #tpu.pipeline_mode<synchronous>, transform_indices = @transform_7, window_bounds = array<i64: 8, 32>}, {pipeline_mode = #tpu.pipeline_mode<synchronous>, transform_indices = @transform_8, window_bounds = array<i64: 32, 128>}, {pipeline_mode = #tpu.pipeline_mode<synchronous>, transform_indices = @transform_9, window_bounds = array<i64: 1, 128>}, {transform_indices = @transform_10, window_bounds = array<i64: 16, 128>}, {transform_indices = @transform_11, window_bounds = array<i64: 8, 128>}]} {
    %c0_i32 = arith.constant 0 : i32
    %0 = arith.cmpi eq, %arg1, %c0_i32 : i32
    %1 = arith.extui %0 : i1 to i32
    %c0_i32_0 = arith.constant 0 : i32
    %2 = arith.cmpi ne, %1, %c0_i32_0 : i32
    scf.if %2 {
      %c0_8 = arith.constant 0 : index
      %c0_9 = arith.constant 0 : index
      %10 = vector.load %arg2[%c0_8, %c0_9] : memref<16x32xbf16, #tpu.memory_space<vmem>>, vector<16x32xbf16>
      %c0_10 = arith.constant 0 : index
      %c0_11 = arith.constant 0 : index
      %11 = vector.load %arg3[%c0_10, %c0_11] : memref<32x32xbf16, #tpu.memory_space<vmem>>, vector<32x32xbf16>
      %cst_12 = arith.constant dense<0.000000e+00> : vector<16x32xf32>
      %12 = tpu.matmul %10, %11, %cst_12 {dimension_numbers = #tpu.dot_dimension_numbers<[1], [0], [0], [1], [0, 0, 1, 1], [], []>} : vector<16x32xbf16>, vector<32x32xbf16>, vector<16x32xf32> -> vector<16x32xf32>
      %c0_13 = arith.constant 0 : index
      %c0_14 = arith.constant 0 : index
      %13 = vector.load %arg4[%c0_13, %c0_14] : memref<1x32xf32, #tpu.memory_space<vmem>>, vector<1x32xf32>
      %14 = vector.broadcast %13 : vector<1x32xf32> to vector<16x32xf32>
      %15 = arith.addf %12, %14 : vector<16x32xf32>
      %cst_15 = arith.constant 5.000000e-01 : f32
      %16 = vector.broadcast %cst_15 : f32 to vector<16x32xf32>
      %17 = arith.mulf %16, %15 : vector<16x32xf32>
      %cst_16 = arith.constant 0.707106769 : f32
      %18 = vector.broadcast %cst_16 : f32 to vector<16x32xf32>
      %19 = arith.mulf %15, %18 : vector<16x32xf32>
      %20 = math.erf %19 : vector<16x32xf32>
      %cst_17 = arith.constant 1.000000e+00 : f32
      %21 = vector.broadcast %cst_17 : f32 to vector<16x32xf32>
      %22 = arith.addf %21, %20 : vector<16x32xf32>
      %23 = arith.mulf %17, %22 : vector<16x32xf32>
      %cst_18 = arith.constant dense<0.000000e+00> : vector<16xf32>
      %24 = vector.multi_reduction <add>, %23, %cst_18 [1] : vector<16x32xf32> to vector<16xf32>
      %25 = vector.shape_cast %24 : vector<16xf32> to vector<16x1xf32>
      %cst_19 = arith.constant 3.200000e+01 : f32
      %26 = vector.broadcast %cst_19 : f32 to vector<16x1xf32>
      %27 = arith.divf %25, %26 : vector<16x1xf32>
      %28 = vector.broadcast %27 : vector<16x1xf32> to vector<16x32xf32>
      %29 = arith.subf %23, %28 : vector<16x32xf32>
      %30 = vector.broadcast %27 : vector<16x1xf32> to vector<16x32xf32>
      %31 = arith.subf %23, %30 : vector<16x32xf32>
      %32 = arith.mulf %29, %31 : vector<16x32xf32>
      %cst_20 = arith.constant dense<0.000000e+00> : vector<16xf32>
      %33 = vector.multi_reduction <add>, %32, %cst_20 [1] : vector<16x32xf32> to vector<16xf32>
      %34 = vector.shape_cast %33 : vector<16xf32> to vector<16x1xf32>
      %cst_21 = arith.constant 3.200000e+01 : f32
      %35 = vector.broadcast %cst_21 : f32 to vector<16x1xf32>
      %36 = arith.divf %34, %35 : vector<16x1xf32>
      %37 = vector.broadcast %27 : vector<16x1xf32> to vector<16x32xf32>
      %38 = arith.subf %23, %37 : vector<16x32xf32>
      %cst_22 = arith.constant 9.99999996E-13 : f32
      %39 = vector.broadcast %cst_22 : f32 to vector<16x1xf32>
      %40 = arith.addf %36, %39 : vector<16x1xf32>
      %41 = math.rsqrt %40 : vector<16x1xf32>
      %42 = vector.broadcast %41 : vector<16x1xf32> to vector<16x32xf32>
      %43 = arith.mulf %38, %42 : vector<16x32xf32>
      %c0_23 = arith.constant 0 : index
      %c0_24 = arith.constant 0 : index
      %44 = vector.load %arg5[%c0_23, %c0_24] : memref<1x32xf32, #tpu.memory_space<vmem>>, vector<1x32xf32>
      %45 = vector.broadcast %44 : vector<1x32xf32> to vector<16x32xf32>
      %46 = arith.mulf %43, %45 : vector<16x32xf32>
      %c0_25 = arith.constant 0 : index
      %c0_26 = arith.constant 0 : index
      %47 = vector.load %arg6[%c0_25, %c0_26] : memref<1x32xf32, #tpu.memory_space<vmem>>, vector<1x32xf32>
      %48 = vector.broadcast %47 : vector<1x32xf32> to vector<16x32xf32>
      %49 = arith.addf %46, %48 : vector<16x32xf32>
      %50 = arith.truncf %49 : vector<16x32xf32> to vector<16x32xbf16>
      %c0_27 = arith.constant 0 : index
      %c0_28 = arith.constant 0 : index
      %51 = vector.load %arg14[%c0_27, %c0_28] : memref<16x32xbf16, #tpu.memory_space<vmem>>, vector<16x32xbf16>
      tpu.vector_store %arg14[%c0_27, %c0_28], %50 {strides = array<i32>} : memref<16x32xbf16, #tpu.memory_space<vmem>>, vector<16x32xbf16>,
      %c0_29 = arith.constant 0 : index
      %c0_30 = arith.constant 0 : index
      %52 = vector.load %arg9[%c0_29, %c0_30] : memref<8x32xf32, #tpu.memory_space<vmem>>, vector<8x32xf32>
      %c0_31 = arith.constant 0 : index
      %c0_32 = arith.constant 0 : index
      %53 = vector.load %arg10[%c0_31, %c0_32] : memref<32x128xf32, #tpu.memory_space<vmem>>, vector<32x128xf32>
      %cst_33 = arith.constant dense<0.000000e+00> : vector<8x128xf32>
      %54 = tpu.matmul %52, %53, %cst_33 {dimension_numbers = #tpu.dot_dimension_numbers<[1], [0], [0], [1], [0, 0, 1, 1], [], []>} : vector<8x32xf32>, vector<32x128xf32>, vector<8x128xf32> -> vector<8x128xf32>
      %c0_34 = arith.constant 0 : index
      %c0_35 = arith.constant 0 : index
      %55 = vector.load %arg11[%c0_34, %c0_35] : memref<1x128xf32, #tpu.memory_space<vmem>>, vector<1x128xf32>
      %56 = vector.broadcast %55 : vector<1x128xf32> to vector<8x128xf32>
      %57 = arith.addf %54, %56 : vector<8x128xf32>
      %c0_36 = arith.constant 0 : index
      %c0_37 = arith.constant 0 : index
      %58 = vector.load %arg13[%c0_36, %c0_37] : memref<8x128xf32, #tpu.memory_space<vmem>>, vector<8x128xf32>
      tpu.vector_store %arg13[%c0_36, %c0_37], %57 {strides = array<i32>} : memref<8x128xf32, #tpu.memory_space<vmem>>, vector<8x128xf32>,
    } else {
    }
    %c0 = arith.constant 0 : index
    %c0_1 = arith.constant 0 : index
    %3 = vector.load %arg14[%c0, %c0_1] : memref<16x32xbf16, #tpu.memory_space<vmem>>, vector<16x32xbf16>
    %c0_2 = arith.constant 0 : index
    %c0_3 = arith.constant 0 : index
    %4 = vector.load %arg7[%c0_2, %c0_3] : memref<32x128xbf16, #tpu.memory_space<vmem>>, vector<32x128xbf16>
    %cst = arith.constant dense<0.000000e+00> : vector<16x128xf32>
    %5 = tpu.matmul %3, %4, %cst {dimension_numbers = #tpu.dot_dimension_numbers<[1], [0], [0], [1], [0, 0, 1, 1], [], []>} : vector<16x32xbf16>, vector<32x128xbf16>, vector<16x128xf32> -> vector<16x128xf32>
    %c0_4 = arith.constant 0 : index
    %c0_5 = arith.constant 0 : index
    %6 = vector.load %arg8[%c0_4, %c0_5] : memref<1x128xf32, #tpu.memory_space<vmem>>, vector<1x128xf32>
    %7 = vector.broadcast %6 : vector<1x128xf32> to vector<16x128xf32>
    %8 = arith.addf %5, %7 : vector<16x128xf32>
    %c0_6 = arith.constant 0 : index
    %c0_7 = arith.constant 0 : index
    %9 = vector.load %arg12[%c0_6, %c0_7] : memref<16x128xf32, #tpu.memory_space<vmem>>, vector<16x128xf32>
    tpu.vector_store %arg12[%c0_6, %c0_7], %8 {strides = array<i32>} : memref<16x128xf32, #tpu.memory_space<vmem>>, vector<16x128xf32>,
    return
  }
  func.func @transform_0(%arg0: i32, %arg1: i32) -> (i32, i32) {
    %c0_i32 = arith.constant 0 : i32
    %c0_i32_0 = arith.constant 0 : i32
    return %arg0, %c0_i32 : i32, i32
  }
  func.func @transform_1(%arg0: i32, %arg1: i32) -> (i32, i32) {
    %c0_i32 = arith.constant 0 : i32
    %c0_i32_0 = arith.constant 0 : i32
    %c0_i32_1 = arith.constant 0 : i32
    return %c0_i32, %c0_i32_0 : i32, i32
  }
  func.func @transform_2(%arg0: i32, %arg1: i32) -> (i32, i32) {
    %c0_i32 = arith.constant 0 : i32
    %c0_i32_0 = arith.constant 0 : i32
    %c0_i32_1 = arith.constant 0 : i32
    return %c0_i32, %c0_i32_0 : i32, i32
  }
  func.func @transform_3(%arg0: i32, %arg1: i32) -> (i32, i32) {
    %c0_i32 = arith.constant 0 : i32
    %c0_i32_0 = arith.constant 0 : i32
    %c0_i32_1 = arith.constant 0 : i32
    return %c0_i32, %c0_i32_0 : i32, i32
  }
  func.func @transform_4(%arg0: i32, %arg1: i32) -> (i32, i32) {
    %c0_i32 = arith.constant 0 : i32
    %c0_i32_0 = arith.constant 0 : i32
    %c0_i32_1 = arith.constant 0 : i32
    return %c0_i32, %c0_i32_0 : i32, i32
  }
  func.func @transform_5(%arg0: i32, %arg1: i32) -> (i32, i32) {
    %c0_i32 = arith.constant 0 : i32
    %c0_i32_0 = arith.constant 0 : i32
    return %c0_i32, %arg1 : i32, i32
  }
  func.func @transform_6(%arg0: i32, %arg1: i32) -> (i32, i32) {
    %c0_i32 = arith.constant 0 : i32
    %c0_i32_0 = arith.constant 0 : i32
    return %c0_i32, %arg1 : i32, i32
  }
  func.func @transform_7(%arg0: i32, %arg1: i32) -> (i32, i32) {
    %c0_i32 = arith.constant 0 : i32
    %c0_i32_0 = arith.constant 0 : i32
    %c0_i32_1 = arith.constant 0 : i32
    return %c0_i32, %c0_i32_0 : i32, i32
  }
  func.func @transform_8(%arg0: i32, %arg1: i32) -> (i32, i32) {
    %c0_i32 = arith.constant 0 : i32
    %c0_i32_0 = arith.constant 0 : i32
    %c0_i32_1 = arith.constant 0 : i32
    return %c0_i32, %c0_i32_0 : i32, i32
  }
  func.func @transform_9(%arg0: i32, %arg1: i32) -> (i32, i32) {
    %c0_i32 = arith.constant 0 : i32
    %c0_i32_0 = arith.constant 0 : i32
    %c0_i32_1 = arith.constant 0 : i32
    return %c0_i32, %c0_i32_0 : i32, i32
  }
  func.func @transform_10(%arg0: i32, %arg1: i32) -> (i32, i32) {
    %c0_i32 = arith.constant 0 : i32
    return %arg0, %arg1 : i32, i32
  }
  func.func @transform_11(%arg0: i32, %arg1: i32) -> (i32, i32) {
    %c0_i32 = arith.constant 0 : i32
    %c0_i32_0 = arith.constant 0 : i32
    return %arg0, %c0_i32 : i32, i32
  }
}

</mosaic_0001>

<bundles_post_ra>
// kernel: tpu_custom_call.1
= control target key start
LH: loop header
LB: loop body
LE: loop exit
PB: predicated region body
PF: predicated region fallthrough
CT: control target
= control target key end

     0   :  { %s1831_s0 = inlined_call_operand.hbm [shape: bf16[16,32], index: 0, kind: input, shape index: {}]   ;;  %s1832_s1 = inlined_call_operand.hbm [shape: bf16[32,32], index: 1, kind: input, shape index: {}]   ;;  %s1833_s2 = inlined_call_operand.vmem [shape: f32[1,32], index: 2, kind: input, shape index: {}]   ;;  %s1834_s3 = inlined_call_operand.vmem [shape: f32[1,32], index: 3, kind: input, shape index: {}]   ;;  %s1835_s4 = inlined_call_operand.vmem [shape: f32[1,32], index: 4, kind: input, shape index: {}]   ;;  %s1836_s5 = inlined_call_operand.hbm [shape: bf16[32,512], index: 5, kind: input, shape index: {}]   ;;  %s1837_s6 = inlined_call_operand.vmem [shape: f32[1,512], index: 6, kind: input, shape index: {}]   ;;  %s1838_s7 = inlined_call_operand.vmem [shape: f32[8,32], index: 7, kind: input, shape index: {}]   ;;  %s1839_s8 = inlined_call_operand.hbm [shape: f32[32,128], index: 8, kind: input, shape index: {}]   ;;  %s1840_s9 = inlined_call_operand.vmem [shape: f32[1,128], index: 9, kind: input, shape index: {}]   ;;  %s1841_s10 = inlined_call_operand.hbm [shape: f32[16,512], index: 10, kind: output, shape index: {0}]   ;;  %s1842_s11 = inlined_call_operand.hbm [shape: f32[8,128], index: 11, kind: output, shape index: {1}]  }
   0x1   :  { %1855 = sst [smem:[#allocation22_spill]] %s1833_s2 }
   0x2   :  { %1856 = sst [smem:[#allocation23_spill]] %s1834_s3 }
   0x3   :  { %1857 = sst [smem:[#allocation24_spill]] %s1835_s4 }
   0x4   :  { %1858 = sst [smem:[#allocation25_spill]] %s1838_s7 }
   0x5   :  { %1859 = sst [smem:[#allocation26_spill]] %s1840_s9 }
   0x6   :  { %1860 = sst [smem:[#allocation27_spill]] %s1841_s10 }
   0x7   :  { %1861 = sst [smem:[#allocation28_spill]] %s1842_s11 }
   0x8   :  { %17 = vsyncpa [#allocation4], 0 }
   0x9   :  { %18 = vsyncpa [#allocation7], 0 }
   0xa   :  { %19 = vsyncpa [#allocation5], 0 }
   0xb   :  { %21 = vsyncpa [#allocation5 + $0x1], 0 }
   0xc   :  { %22 = vsyncpa [#allocation12], 0  ;;  %s1469_s17 = smov 0   ;;  %s1471_s18 = smov 0  }
   0xd   :  { %s1473_s19 = smov 0   ;;  %s1475_s20 = smov 0  }
   0xe   :  { %s1477_s21 = smov 0   ;;  %s1479_s22 = smov 0  }
   0xf LB: > { %1862 = sst [smem:[#allocation19_spill]] %s1368_s17  ;;  %s1500_s23 = sadd.s32 4294967295, %s1388_s22   ;;  %s1388_s22 = sphi %s1479_s22, %s28_s22   ;;  %s1384_s21 = sphi %s1477_s21, %s1904_s21   ;;  %s1380_s20 = sphi %s1475_s20, %s1903_s20   ;;  %s1376_s19 = sphi %s1473_s19, %s1902_s19   ;;  %s1372_s18 = sphi %s1471_s18, %s1901_s18   ;;  %s1368_s17 = sphi %s1469_s17, %s1900_s17  }
  0x10   : > { %s946_s24 = sadd.s32 4294967294, %s1388_s22   ;;  %p164_p0 = scmp.ne.s32.totalorder %s1376_s19, %s1372_s18 }
  0x11   : > { %p165_p1 = scmp.eq.s32.totalorder %s1388_s22, 0  ;;  %p170_p2 = scmp.ne.s32.totalorder %s1372_s18, %s1368_s17 }
  0x12   : > { %p1849_p3 = scmp.eq.s32.totalorder %s1500_s23, 0  ;;  %p1848_p4 = scmp.eq.s32.totalorder %s1500_s23, 3 }
  0x13   : > { %p1511_p5 = por %p165_p1, %p164_p0  ;;  %p291_p6 = scmp.eq.s32.totalorder %s946_s24, 3 }
  0x14   : > { %p1517_p7 = por %p1849_p3, %p170_p2  ;;  %p1523_p8 = por %p1848_p4, %p164_p0 }
  0x15   : > { %p1527_p9 = por %p291_p6, %p170_p2  ;;  %p947_p10 = scmp.ge.s32.totalorder %s1388_s22, 1 }
  0x16   : > { %s1864_s27 = scalar_select %p1517_p7, 1, 0 }
  0x17   : > { %s1865_s28 = scalar_select %p1523_p8, 1, 0 }
  0x18   : > { %s1867_s29 = scalar_select %p1527_p9, 1, 0 }
  0x19   : > { %1866 = sst [smem:[#allocation20_spill]] %s1865_s28  ;;  %p324_p11 = scmp.lt.s32.totalorder %s1388_s22, 5 }
  0x1a   : > { %1868 = sst [smem:[#allocation21_spill]] %s1867_s29  ;;  %s1390_s12 = smov [#allocation3]  }
  0x1b   : > { %p1533_p12 = pnand %p947_p10, %p324_p11  ;;  %s339_s13 = sshll.u32 %s1390_s12, 4  ;;  %s1537_s13 = int_to_ptr.vmem [resolvable:$true] %s339_s13 }
  0x1c   : > { %p1065_p0 = scmp.lt.s32.totalorder %s1388_s22, 4  ;;  %s1391_s15 = smov [#allocation6]  }
  0x1d   : > { %s1869_s30 = scalar_select %p1533_p12, 1, 0 }
  0x1e   : > { %p1044_p13 = pneg %p1533_p12  ;;  %s352_s16 = sshll.u32 %s1391_s15, 4  ;;  %s1554_s16 = int_to_ptr.vmem [resolvable:$true] %s352_s16 }
  0x1f   : > { %p1550_p2 = pnand %p1065_p0, %p1511_p5  ;;  %s1150_s29 = scalar_lea.hbm %s1831_s0, 128 }
  0x20   : > { %p1544_p1 = pnand %p1044_p13, %p1849_p3  ;;  %p1151_p6 = scmp.ne.s32.totalorder %s1831_s0, %s1150_s29 }
  0x21   : > { %s1871_s24 = scalar_select %p1550_p2, 1, 0 }
  0x22   : > { %p1564_p10 = pneg %p1544_p1  ;;  %p1157_p13 = scmp.lt.u32.totalorder %s1150_s29, %s1831_s0 }
  0x24   : > { %p1153_p5 = pnand %p1564_p10, %p1151_p6 }
  0x26   : > { %p1154_p11 = pneg %p1153_p5 }
  0x28   : > { %p1159_p0 = pnand %p1157_p13, %p1154_p11 }
  0x2a   : > { %1162 = shalt.err (!%p1159_p0)
}
  0x2b   : > { %s1163_s10 = scalar_lea.vmem %s1537_s13, 128  ;;  %p1171_p8 = scmp.lt.s32.totalorder %s1537_s13, %s1537_s13 }
  0x2c   : > { %p1164_p4 = scmp.ne.s32.totalorder %s1537_s13, %s1163_s10  ;;  %p1172_p7 = scmp.lt.s32.totalorder %s1163_s10, %s1163_s10 }
  0x2e   : > { %p1166_p3 = pnand %p1164_p4, %p1564_p10  ;;  %p1173_p6 = por %p1172_p7, %p1171_p8 }
  0x30   : > { %p1167_p9 = pneg %p1166_p3 }
  0x32   : > { %p1174_p5 = pnand %p1173_p6, %p1167_p9 }
  0x34   : > { %1177 = shalt.err (!%p1174_p5)
}
  0x35   : > { %s1392_s17 = smov 64   ;;  %s1393_s25 = smov 4  }
  0x36   : > { %1047 = dma.hbm_to_vmem [thread:$0]  (!%p1544_p1), %s1831_s0, 128, %s1537_s13, [#allocation4], %s1392_s17, %s1392_s17, %s1393_s25  }
  0x37   : > { %s1394_s26 = smov [#allocation9]   ;;  %s1178_s4 = scalar_lea.hbm %s1832_s1, 256 }
  0x38   : > { %s377_s15 = sshll.u32 %s1394_s26, 4  ;;  %p1179_p3 = scmp.ne.s32.totalorder %s1832_s1, %s1178_s4  ;;  %s378_s15 = int_to_ptr.vmem [resolvable:$true] %s377_s15 }
  0x39   : > { %p1185_p8 = scmp.lt.u32.totalorder %s1178_s4, %s1832_s1 }
  0x3a   : > { %p1181_p4 = pnand %p1179_p3, %p1564_p10 }
  0x3c   : > { %p1182_p7 = pneg %p1181_p4 }
  0x3e   : > { %p1187_p9 = pnand %p1185_p8, %p1182_p7 }
  0x40   : > { %1190 = shalt.err (!%p1187_p9)
}
  0x41   : > { %s1191_s13 = scalar_lea.vmem %s1554_s16, 256  ;;  %p1199_p6 = scmp.lt.s32.totalorder %s1554_s16, %s1554_s16 }
  0x42   : > { %p1192_p11 = scmp.ne.s32.totalorder %s1554_s16, %s1191_s13  ;;  %p1200_p5 = scmp.lt.s32.totalorder %s1191_s13, %s1191_s13 }
  0x44   : > { %p1194_p13 = pnand %p1192_p11, %p1564_p10  ;;  %p1201_p3 = por %p1200_p5, %p1199_p6 }
  0x46   : > { %p1195_p0 = pneg %p1194_p13 }
  0x48   : > { %p1202_p4 = pnand %p1201_p3, %p1195_p0 }
  0x4a   : > { %1205 = shalt.err (!%p1202_p4)
}
  0x4b   : > { %1050 = dma.hbm_to_vmem [thread:$0]  (!%p1544_p1), %s1832_s1, 256, %s1554_s16, [#allocation7], %s1392_s17, %s1392_s17, %s1393_s25  }
  0x4c   : > { %s1206_s9 = scalar_lea.hbm %s1839_s8, 512 }
  0x4d   : > { %p1207_p7 = scmp.ne.s32.totalorder %s1839_s8, %s1206_s9  ;;  %p1213_p11 = scmp.lt.u32.totalorder %s1206_s9, %s1839_s8 }
  0x4f   : > { %p1209_p8 = pnand %p1207_p7, %p1564_p10 }
  0x51   : > { %p1210_p9 = pneg %p1209_p8 }
  0x53   : > { %p1215_p13 = pnand %p1213_p11, %p1210_p9 }
  0x55   : > { %1218 = shalt.err (!%p1215_p13)
}
  0x56   : > { %s1219_s10 = scalar_lea.vmem %s378_s15, 512  ;;  %p1227_p3 = scmp.lt.s32.totalorder %s378_s15, %s378_s15 }
  0x57   : > { %p1220_p0 = scmp.ne.s32.totalorder %s378_s15, %s1219_s10  ;;  %p1228_p4 = scmp.lt.s32.totalorder %s1219_s10, %s1219_s10 }
  0x59   : > { %p1222_p6 = pnand %p1220_p0, %p1564_p10  ;;  %p1229_p12 = por %p1228_p4, %p1227_p3 }
  0x5b   : > { %p1223_p5 = pneg %p1222_p6 }
  0x5d   : > { %p1230_p2 = pnand %p1229_p12, %p1223_p5 }
  0x5f   : > { %1233 = shalt.err (!%p1230_p2)
}
  0x60   : > { %s1395_s16 = smov 128   ;;  %s1396_s13 = smov 8  }
  0x61   : > { %1053 = dma.hbm_to_vmem [thread:$0]  (!%p1544_p1), %s1839_s8, 512, %s378_s15, [#allocation7], %s1395_s16, %s1395_s16, %s1396_s13  }
  0x62   : > { %s394_s3 = sand.u32 1, %s1388_s22   ;;  %s37_s4 = sadd.s32 1, %s1384_s21 }
  0x63   : > { %p38_p12 = scmp.ge.s32.totalorder %s37_s4, 4  ;;  %s396_s7 = sand.u32 1, %s1376_s19  }
  0x64   : > { %s952_s9 = sshll.u32 %s396_s7, 4  ;;  %s953_s11 = sshll.u32 %s1384_s21, 6 }
  0x65   : > { %s1906_s4 = smov (%p38_p12, %s37_s4), 0  ;;  %s1641_s26 = scalar_lea.hbm %s1836_s5, %s953_s11 }
  0x66   : > { %s154_s14 = ssub.s32 %s1384_s21, %s1906_s4  ;;  %s398_s15 = scalar_lea.vmem [#allocation8], %s952_s9 }
  0x67   : > { %s404_s10 = sshll.u32 %s398_s15, 4  ;;  %p155_p1 = scmp.eq.s32.totalorder %s154_s14, 0  ;;  %s1645_s10 = int_to_ptr.vmem [resolvable:$true] %s404_s10 }
  0x68   : > { %s1873_s16 = sadd.s32 1, %s1376_s19  ;;  %s1652_s2 = scalar_lea.sflag [#allocation4], %s394_s3 }
  0x69   : > { %s1650_s13 = scalar_select %p155_p1, %s1376_s19, %s1873_s16  }
  0x6a   : > { %s1234_s28 = scalar_lea.hbm %s1641_s26, 256  ;;  %p1874_p10 = scmp.ne.s32.totalorder %s1871_s24, 0 }
  0x6b   : > { %p1235_p2 = scmp.ne.s32.totalorder %s1641_s26, %s1234_s28  ;;  %s1239_s9 = scalar_lea.hbm %s1836_s5, 1024 }
  0x6c   : > { %p1236_p7 = pneg %p1874_p10  ;;  %p1240_p11 = scmp.lt.u32.totalorder %s1641_s26, %s1836_s5 }
  0x6d   : > { %p1241_p13 = scmp.lt.u32.totalorder %s1239_s9, %s1234_s28  ;;  %p1243_p6 = scmp.lt.u32.totalorder %s1234_s28, %s1641_s26 }
  0x6e   : > { %p1237_p8 = pnand %p1236_p7, %p1235_p2 }
  0x6f   : > { %p1242_p0 = por %p1241_p13, %p1240_p11 }
  0x70   : > { %p1238_p9 = pneg %p1237_p8 }
  0x71   : > { %p1244_p5 = por %p1243_p6, %p1242_p0 }
  0x73   : > { %p1245_p3 = pnand %p1244_p5, %p1238_p9 }
  0x75   : > { %1248 = shalt.err (!%p1245_p3)
}
  0x76   : > { %s1249_s3 = scalar_lea.vmem %s1645_s10, 256  ;;  %s1397_s14 = smov [#allocation8]  }
  0x77   : > { %p1250_p4 = scmp.ne.s32.totalorder %s1645_s10, %s1249_s3  ;;  %s1254_s15 = sshll.u32 %s1397_s14, 4  ;;  %s1255_s15 = int_to_ptr.vmem [resolvable:$false] %s1254_s15 }
  0x78   : > { %s1256_s16 = scalar_lea.vmem %s1255_s15, 512  ;;  %p1257_p2 = scmp.lt.s32.totalorder %s1645_s10, %s1255_s15 }
  0x79   : > { %p1252_p12 = pnand %p1250_p4, %p1236_p7  ;;  %p1258_p8 = scmp.lt.s32.totalorder %s1256_s16, %s1249_s3 }
  0x7b   : > { %p1253_p1 = pneg %p1252_p12  ;;  %p1259_p11 = por %p1258_p8, %p1257_p2 }
  0x7d   : > { %p1260_p13 = pnand %p1259_p11, %p1253_p1 }
  0x7f   : > { %1263 = shalt.err (!%p1260_p13)
}
  0x80   : > { %s1398_s28 = smov 256   ;;  %p1875_p7 = scmp.ne.s32.totalorder %s1869_s30, 0 }
  0x81   : > { %1057 = dma.hbm_to_vmem [thread:$0]  (!%p1874_p10), %s1641_s26, 256, %s1645_s10, %s1652_s2, %s1398_s28, %s1392_s17, %s1393_s25  }
  0x82   : > { %422 = sbr.rel (%p1875_p7) target bundleno = 957 (0x3bd), region = 60  ;;  %p1876_p9 = scmp.eq.s32.totalorder (!%p1875_p7), %s1500_s23, 0 }
  0x89   : > { %1343 = dma.done.wait (%p1876_p9), [#allocation4], 128   ;;  %p1877_p0 = pmov %p1876_p9 }
  0x8b   : > { %1345 = vsyncadd (%p1877_p0), [#allocation4], 4294967168  ;;  %p1878_p6 = pmov %p1877_p0 }
  0x8c   : > { %p1879_p5 = pmov %p1877_p0 }
  0x8d   : > { %1347 = dma.done.wait (%p1878_p6), [#allocation7], 256  }
  0x8e   : > { %1349 = vsyncadd (%p1879_p5), [#allocation7], 4294967040  ;;  %s432_s24 = sand.u32 1, %s1500_s23   ;;  %s434_s17 = sand.u32 1, %s1372_s18  }
  0x8f   : > { %s1696_s30 = sshll.u32 %s434_s17, 4  ;;  %s433_s25 = scalar_lea.sflag [#allocation4], %s432_s24 }
  0x90   : > { %s436_s26 = scalar_lea.vmem [#allocation8], %s1696_s30  ;;  %p1880_p10 = scmp.ne.s32.totalorder %s1864_s27, 0 }
  0x92   : > { %1351 = dma.done.wait (%p1880_p10), %s433_s25, 256  }
  0x93   : > { %1353 = vsyncadd (%p1880_p10), %s433_s25, 4294967040  ;;  %p1881_p3 = pmov %p1877_p0 }
  0x94   : > { %p1882_p4 = pmov %p1877_p0 }
  0x95   : > { %1355 = dma.done.wait (%p1881_p3), [#allocation7], 512  }
  0x96   : > { %1357 = vsyncadd (%p1882_p4), [#allocation7], 4294966784  ;;  %p483_p12 = scmp.lt.s32.totalorder %s1380_s20, 3  ;;  %s1716_s9 = scalar_lea.vmem [#allocation10], %s1696_s30 }
  0x97   : > { %p960_p1 = scmp.ne.s32.totalorder %s1380_s20, 0 }
  0x98   : > { %s1709_s10 = scalar_select %p483_p12, %s1380_s20, 3 }
  0x99   : > { %491 = sbr.rel (%p960_p1) target bundleno = 713 (0x2c9), region = 80  ;;  %v1137_v0 = vld [vmem:[#allocation6] sm:$0xff] (!%p960_p1)   ;;  %v1399_v1 = vmov (!%p960_p1), 0.0   ;;  %v1138_v2 = vld [vmem:[#allocation6 + $0x8] sm:$0xff] (!%p960_p1)   ;;  %vm1400_vm0 = vmmov (!%p960_p1), 0   ;;  %v1139_v3 = vld [vmem:[#allocation3] sm:$0xff] (!%p960_p1)  }
  0x9a   : > { %s485_s11 = scalar_lea.vmem %s1837_s6, %s1709_s10  ;;  %991 = vmatprep.subr.bf16.mxu0 (!%p960_p1), %v1399_v1  ;;  %995 = vmatprep.mubr.msk.bf16.mxu0 (!%p960_p1), %vm1400_vm0, %v1399_v1  ;;  %vm522_vm1 = vcmask (!%p960_p1), 261120   ;;  %v625_v4 = vld [vmem:[#allocation9] sm:$0xff] (!%p960_p1)  ;;  %v626_v5 = vld [vmem:[#allocation9 + $0x8] sm:$0xff] (!%p960_p1)  ;;  %v627_v6 = vld [vmem:[#allocation9 + $0x10] sm:$0xff] (!%p960_p1)  ;;  %v1401_v7 = vmov (!%p960_p1), 0.0|0.0   ;;  %s1883_s12 = sld [smem:[#allocation25_spill]] (!%p960_p1) }
  0x9b   : > { %992 = vmatpush3.bf16.msra.mxu0 (!%p960_p1), %v1137_v0  ;;  %1007 = vmatprep.mubr.msk.f32.mxu1 (!%p960_p1), %vm1400_vm0, %v1399_v1  ;;  %v1019_v8 = vpack.c.bf16 (!%p960_p1), %v626_v5, %v625_v4  ;;  %v628_v9 = vld [vmem:[#allocation9 + $0x18] sm:$0xff] (!%p960_p1)  ;;  %s1884_s15 = sld [smem:[#allocation22_spill]] (!%p960_p1)  ;;  %s1885_s24 = sld [smem:[#allocation26_spill]] (!%p960_p1) }
  0x9c   : > { %993 = vmatprep.subr.bf16.mxu0 (!%p960_p1), %v1399_v1  ;;  %1018 = vmatprep.subr.bf16.mxu1 (!%p960_p1), %v1401_v7  ;;  %v1022_v10 = vpack.c.bf16 (!%p960_p1), %v628_v9, %v627_v6  ;;  %s1886_s7 = sld [smem:[#allocation23_spill]] (!%p960_p1) }
  0x9d   : > { %1020 = vmatpush3.bf16.msra.mxu1 (!%p960_p1), %v1019_v8 }
  0x9e   : > { %1021 = vmatprep.subr.bf16.mxu1 (!%p960_p1), %v1401_v7 }
  0x9f   : > { %994 = vmatpush3.bf16.msra.mxu0 (!%p960_p1), %v1138_v2 }
  0xa0   : > { %v624_v11 = vld [vmem:[%s1883_s12] sm:$0xff]  ;;  %s1887_s12 = sld [smem:[#allocation24_spill]] }
  0xa1   : > { %1023 = vmatpush3.bf16.msra.mxu1 %v1022_v10  ;;  %v961_v12 = vld [vmem:[%s1884_s15] ss:$0 sm:$0xff] }
  0xa2   : > { %996 = vmatmul.mubr.msk.bf16.vlgmr.msra.gmra.mrb[0].mxu0 %vm522_vm1, %v1139_v3  ;;  %v968_v42 = vld [vmem:[%s1885_s24] ss:$0 sm:$0xff] }
  0xa3   : > { %v966_v53 = vld [vmem:[%s1886_s7] ss:$0 sm:$0xff] }
  0xa4   : > { %1008 = vmatmul.mubr.msk.f32.vlgmr.msra.gmra.mrb[0].mxu1 %vm522_vm1, %v624_v11 }
  0xa6   : > { %v967_v57 = vld [vmem:[%s1887_s12] ss:$0 sm:$0xff] }
 0x175   : > { %v560_v13 = vpop.f32.mrb[0].mxu0 }
 0x176   : > { %v561_v14 = vadd.f32 %v961_v12, %v560_v13  ;;  %v997_v15 = vpop.f32.mrb[1].mxu0 }
 0x177   : > { %v563_v16 = vpop.f32.mrb[2].mxu0  ;;  %v705_v41 = vpop.f32.mrb[0].mxu1 }
 0x178   : > { %v569_v17 = vmul.f32 0.70710677, %v561_v14  ;;  %v564_v18 = vadd.f32 %v961_v12, %v563_v16  ;;  %v998_v19 = vpop.f32.mrb[3].mxu0  ;;  %v567_v22 = vmul.f32 0.5, %v561_v14  ;;  %v1009_v43 = vpop.f32.mrb[1].mxu1  ;;  %v706_v44 = vadd.f32 %v968_v42, %v705_v41 }
 0x17a   : > { %1140 = verf.f32 %v569_v17  ;;  %v570_v20 = vmul.f32 0.70710677, %v564_v18  ;;  %v568_v25 = vmul.f32 0.5, %v564_v18  ;;  %709 = vst [vmem:[#allocation11] sm:$0xff] %v706_v44 }
 0x17c   : > { %1142 = verf.f32 %v570_v20 }
 0x184   : > { %v1141_v21 = vpop.eup %1140 }
 0x185   : > { %v573_v23 = vadd.f32 1.0, %v1141_v21 }
 0x186   : > { %v1143_v24 = vpop.eup %1142 }
 0x187   : > { %v575_v26 = vmul.f32 %v573_v23, %v567_v22  ;;  %v574_v27 = vadd.f32 1.0, %v1143_v24 }
 0x189   : > { %v577_v28 = vsel %vm522_vm1, %v575_v26, 0.0  ;;  %v576_v29 = vmul.f32 %v574_v27, %v568_v25 }
 0x18a   : > { %578 = vadd.xlane.f32.xlu0 %v577_v28 }
 0x18b   : > { %v580_v30 = vsel %vm522_vm1, %v576_v29, 0.0 }
 0x18e   : > { %581 = vadd.xlane.f32.xlu0 %v580_v30 }
 0x217   : > { %v579_v31 = vpop.xlane.xlu0 %578 }
 0x218   : > { %v584_v32 = vmul.f32 0.03125, %v579_v31 }
 0x21a   : > { %v586_v33 = vsub.f32 %v575_v26, %v584_v32 }
 0x21b   : > { %v582_v34 = vpop.xlane.xlu0 %581 }
 0x21c   : > { %v585_v35 = vmul.f32 0.03125, %v582_v34  ;;  %v588_v36 = vmul.f32 %v586_v33, %v586_v33 }
 0x21e   : > { %v587_v37 = vsub.f32 %v576_v29, %v585_v35  ;;  %v590_v38 = vsel %vm522_vm1, %v588_v36, 0.0 }
 0x21f   : > { %591 = vadd.xlane.f32.xlu1 %v590_v38 }
 0x220   : > { %v589_v39 = vmul.f32 %v587_v37, %v587_v37 }
 0x222   : > { %v593_v40 = vsel %vm522_vm1, %v589_v39, 0.0 }
 0x223   : > { %594 = vadd.xlane.f32.xlu1 %v593_v40 }
 0x2ac   : > { %v592_v45 = vpop.xlane.xlu1 %591 }
 0x2ad   : > { %v596_v46 = vmul.f32 0.03125, %v592_v45 }
 0x2af   : > { %v598_v47 = vadd.f32 1e-12, %v596_v46 }
 0x2b0   : > { %v595_v48 = vpop.xlane.xlu1 %594 }
 0x2b1   : > { %1144 = vrsqrt.f32 %v598_v47  ;;  %v597_v49 = vmul.f32 0.03125, %v595_v48 }
 0x2b3   : > { %v599_v50 = vadd.f32 1e-12, %v597_v49 }
 0x2b5   : > { %1146 = vrsqrt.f32 %v599_v50 }
 0x2bb   : > { %v1145_v51 = vpop.eup %1144 }
 0x2bc   : > { %v602_v52 = vmul.f32 %v1145_v51, %v586_v33 }
 0x2be   : > { %v611_v55 = vmul.f32 %v966_v53, %v602_v52 }
 0x2bf   : > { %v1147_v54 = vpop.eup %1146 }
 0x2c0   : > { %v603_v56 = vmul.f32 %v1147_v54, %v587_v37  ;;  %v620_v59 = vadd.f32 %v967_v57, %v611_v55 }
 0x2c2   : > { %v612_v58 = vmul.f32 %v966_v53, %v603_v56 }
 0x2c4   : > { %v621_v60 = vadd.f32 %v967_v57, %v612_v58 }
 0x2c6   : > { %v622_v61 = vpack.c.bf16 %v621_v60, %v620_v59 }
 0x2c8   : > { %623 = vst.msk [vmem:[#allocation2] sm:$0xff] %vm522_vm1, %v622_v61 }
 0x2c9 PF: > { %v1148_v62 = vld [vmem:[%s436_s26] sm:$0xff]   ;;  %v1402_v63 = vmov 0.0   ;;  %v1149_v0 = vld [vmem:[%s436_s26 + $0x8] sm:$0xff]   ;;  %vm1403_vm2 = vmmov 0   ;;  %vm734_vm3 = vcmask 261120   ;;  %s1404_s3 = smov [#allocation11]  }
 0x2ca   : > { %1010 = vmatprep.subr.bf16.mxu0 %v1402_v63  ;;  %1014 = vmatprep.mubr.msk.bf16.mxu0 %vm1403_vm2, %v1402_v63  ;;  %s813_s14 = sshll.u32 %s1404_s3, 4  ;;  %p1888_p8 = scmp.eq.s32.totalorder %s1500_s23, 3  ;;  %s814_s14 = int_to_ptr.vmem [resolvable:$true] %s813_s14 }
 0x2cb   : > { %1011 = vmatpush3.bf16.msra.mxu0 %v1148_v62  ;;  %s1264_s15 = scalar_lea.vmem %s814_s14, 128  ;;  %p1271_p7 = scmp.lt.s32.totalorder %s814_s14, %s814_s14 }
 0x2cc   : > { %1012 = vmatprep.subr.bf16.mxu0 %v1402_v63  ;;  %p1265_p2 = scmp.ne.s32.totalorder %s814_s14, %s1264_s15  ;;  %p1272_p9 = scmp.lt.s32.totalorder %s1264_s15, %s1264_s15 }
 0x2ce   : > { %p1266_p11 = pnand %p1265_p2, %p1888_p8  ;;  %p1273_p0 = por %p1272_p9, %p1271_p7 }
 0x2cf   : > { %1013 = vmatpush3.bf16.msra.mxu0 %v1149_v0  ;;  %v710_v1 = vld [vmem:[#allocation2] sm:$0xff] }
 0x2d0   : > { %p1267_p13 = pneg %p1266_p11 }
 0x2d2   : > { %1015 = vmatmul.mubr.msk.bf16.vlgmr.msra.gmra.mrb[0].mxu0 %vm734_vm3, %v710_v1  ;;  %p1274_p6 = pnand %p1273_p0, %p1267_p13 }
 0x2d4   : > { %1277 = shalt.err (!%p1274_p6)
}
 0x2d5   : > { %s1889_s16 = sld [smem:[#allocation28_spill]]  ;;  %p1890_p10 = pmov %p1888_p8 }
 0x2db   : > { %s1278_s28 = scalar_lea.hbm %s1889_s16, 128 }
 0x2dc   : > { %p1279_p5 = scmp.ne.s32.totalorder %s1889_s16, %s1278_s28  ;;  %p1284_p12 = scmp.lt.u32.totalorder %s1278_s28, %s1889_s16 }
 0x2de   : > { %p1280_p3 = pnand %p1279_p5, %p1890_p10 }
 0x2e0   : > { %p1281_p4 = pneg %p1280_p3 }
 0x2e2   : > { %p1286_p1 = pnand %p1284_p12, %p1281_p4 }
 0x2e4   : > { %1289 = shalt.err (!%p1286_p1)
}
 0x2e5   : > { %p1891_p2 = pmov %p1888_p8  ;;  %v970_v2 = vld [vmem:[%s485_s11] ss:$0 sm:$0xff]  ;;  %s1892_s15 = sld [smem:[#allocation20_spill]] }
 0x2e6   : > { %s975_s30 = sshll.u32 %s1380_s20, 7  ;;  %s797_s26 = sshll.u32 %s1716_s9, 4  ;;  %s1775_s26 = int_to_ptr.vmem [resolvable:$true] %s797_s26 }
 0x2e7   : > { %1040 = dma.vmem_to_hbm [thread:$0]  (%p1891_p2), %s814_s14, 128, %s1889_s16, [#allocation12]  }
 0x2e8   : > { %s1893_s25 = sld [smem:[#allocation27_spill]]  ;;  %s1781_s20 = scalar_lea.sflag [#allocation5], %s434_s17 }
 0x2e9   : > { %s1290_s10 = scalar_lea.vmem %s1775_s26, 256  ;;  %s1405_s11 = smov [#allocation10]  }
 0x2ea   : > { %p1291_p8 = scmp.ne.s32.totalorder %s1775_s26, %s1290_s10  ;;  %s1294_s14 = sshll.u32 %s1405_s11, 4  ;;  %s1295_s14 = int_to_ptr.vmem [resolvable:$false] %s1294_s14 }
 0x2eb   : > { %p1894_p11 = scmp.ne.s32.totalorder %s1892_s15, 0  ;;  %s1296_s7 = scalar_lea.vmem %s1295_s14, 512 }
 0x2ec   : > { %p1297_p9 = scmp.lt.s32.totalorder %s1775_s26, %s1295_s14  ;;  %p1298_p0 = scmp.lt.s32.totalorder %s1296_s7, %s1290_s10 }
 0x2ed   : > { %p1292_p13 = pnand %p1291_p8, %p1894_p11 }
 0x2ee   : > { %s1773_s2 = scalar_lea.hbm %s1893_s25, %s975_s30  ;;  %p1299_p6 = por %p1298_p0, %p1297_p9 }
 0x2ef   : > { %p1293_p7 = pneg %p1292_p13 }
 0x2f1   : > { %p1300_p5 = pnand %p1299_p6, %p1293_p7 }
 0x3a5   : > { %v772_v3 = vpop.f32.mrb[0].mxu0 }
 0x3a6   : > { %v773_v4 = vadd.f32 %v970_v2, %v772_v3  ;;  %v1016_v5 = vpop.f32.mrb[1].mxu0 }
 0x3a7   : > { %v775_v6 = vpop.f32.mrb[2].mxu0 }
 0x3a8   : > { %779 = vst [vmem:[%s1716_s9] sm:$0xff] %v773_v4  ;;  %v776_v7 = vadd.f32 %v970_v2, %v775_v6  ;;  %v1017_v8 = vpop.f32.mrb[3].mxu0 }
 0x3aa   : > { %780 = vst [vmem:[%s1716_s9 + $0x8] sm:$0xff] %v776_v7 }
 0x3ab   : > { %1303 = shalt.err (!%p1300_p5)
}
 0x3ac   : > { %s1304_s17 = scalar_lea.hbm %s1773_s2, 256  ;;  %s1308_s29 = scalar_lea.hbm %s1893_s25, 1024 }
 0x3ad   : > { %p1305_p10 = scmp.ne.s32.totalorder %s1773_s2, %s1304_s17  ;;  %p1309_p12 = scmp.lt.u32.totalorder %s1773_s2, %s1893_s25 }
 0x3ae   : > { %p1310_p1 = scmp.lt.u32.totalorder %s1308_s29, %s1304_s17  ;;  %p1312_p8 = scmp.lt.u32.totalorder %s1304_s17, %s1773_s2 }
 0x3af   : > { %p1306_p3 = pnand %p1305_p10, %p1894_p11 }
 0x3b0   : > { %p1311_p2 = por %p1310_p1, %p1309_p12 }
 0x3b1   : > { %p1307_p4 = pneg %p1306_p3 }
 0x3b2   : > { %p1313_p13 = por %p1312_p8, %p1311_p2 }
 0x3b4   : > { %p1314_p7 = pnand %p1313_p13, %p1307_p4 }
 0x3b6   : > { %1317 = shalt.err (!%p1314_p7)
}
 0x3b7   : > { %s1406_s30 = smov 128   ;;  %s1407_s28 = smov 512  }
 0x3b8   : > { %s1408_s24 = smov 8   ;;  %p1895_p9 = scmp.eq.s32.totalorder %s1500_s23, 3 }
 0x3b9   : > { %1038 = dma.vmem_to_hbm [thread:$0]  (%p1894_p11), %s1775_s26, 256, %s1773_s2, %s1781_s20, %s1406_s30, %s1407_s28, %s1408_s24  }
 0x3ba   : > { %1359 = dma.done.wait (%p1895_p9), [#allocation12], 128   ;;  %p1896_p0 = pmov %p1895_p9 }
 0x3bc   : > { %1361 = vsyncadd (%p1896_p0), [#allocation12], 4294967168 }
 0x3bd PF: > { %s1897_s10 = sld [smem:[#allocation19_spill]]  ;;  %s1898_s11 = sld [smem:[#allocation21_spill]] }
 0x3be   : > { %p1071_p6 = scmp.ge.s32.totalorder %s1388_s22, 2 }
 0x3c3   : > { %s829_s14 = sand.u32 1, %s1897_s10   ;;  %p1899_p5 = scmp.ne.s32.totalorder %s1898_s11, 0 }
 0x3c4   : > { %s830_s7 = scalar_lea.sflag [#allocation5], %s829_s14 }
 0x3c5   : > { %p1059_p10 = pnand %p1071_p6, %p1899_p5 }
 0x3c7   : > { %1363 = dma.done.wait (!%p1059_p10), %s830_s7, 256  }
 0x3c8   : > { %1365 = vsyncadd (!%p1059_p10), %s830_s7, 4294967040  ;;  %s28_s22 = sadd.s32 1, %s1388_s22   ;;  %s1900_s17 = smov %s1372_s18 }
 0x3c9   : > { %p25_p3 = scmp.ge.s32.totalorder %s28_s22, 6   ;;  %s1901_s18 = smov %s1376_s19 }
 0x3ca   : > { %s1902_s19 = smov %s1650_s13  ;;  %s1903_s20 = smov %s1384_s21 }
 0x3cb   : > { %s1904_s21 = smov %s1906_s4  ;;  %27 = sbr.rel (!%p25_p3) target bundleno = 15 (0xf), region = 133 }
 0x3d2   :  { %835 = vsyncpa [#allocation4], 1 }
 0x3d3   :  { %837 = vsyncpa [#allocation4 + $0x1], 1 }
 0x3d4   :  { %838 = vsyncpa [#allocation7], 1 }
 0x3d5   :  { %839 = vsyncpa [#allocation5], 1 }
 0x3d6   :  { %841 = vsyncpa [#allocation5 + $0x1], 1 }
 0x3d7   :  { %842 = vsyncpa [#allocation12], 1 }

</bundles_post_ra>
